<compile_context>
chip_gen: v7x
topology: tpu7x:2x2x1
jax: 0.10.0
libtpu: 0.0.40
codegen_flags: <defaults>
</compile_context>

<pallas_src>
import functools

import jax
import jax.numpy as jnp
from jax.experimental import pallas as pl
from jax.experimental.pallas import tpu as pltpu


# ---------------------------------------------------------------------------
# Fused Pallas kernel: layer1 -> ReLU -> (pooled) layer2, all in VMEM
# ---------------------------------------------------------------------------
def _make_fused_gcn_kernel(xw_first):
    def kernel(a_ref, ap_ref, x_ref, w1_ref, b1_ref, w2_ref, b2_ref, o_ref):
        f32, bf16 = jnp.float32, jnp.bfloat16
        a = a_ref[0]          # (n_pad, n_pad) bf16
        x = x_ref[0]          # (n_pad, f_pad) bf16

        # ---- layer 1: h = relu(A_hat @ X @ W1 + b1)
        # Association chosen at trace time so the smaller contraction dim goes
        # through the N^2 dot (bf16 MXU operands, f32 accumulation).
        if xw_first:
            xw = jnp.dot(x, w1_ref[...], preferred_element_type=f32)
            h = jnp.dot(a, xw.astype(bf16), preferred_element_type=f32)
        else:
            ax = jnp.dot(a, x, preferred_element_type=f32)
            h = jnp.dot(ax.astype(bf16), w1_ref[...], preferred_element_type=f32)
        # Padded node rows of h become relu(b1); they never leave the kernel
        # and are ignored because the matching columns of a_pooled are zero.
        h = jnp.maximum(h + b1_ref[...], 0.0)            # f32, transient value

        # ---- layer 2 + global mean pool (algebraic hoist, batch=None only):
        #   mean_rows(A @ (H @ W2) + b2) == (mean_rows(A) @ H) @ W2 + b2
        # a_pooled / W2 / b2 stay f32 (tiny operands, better accuracy).
        pooled = jnp.dot(ap_ref[0], h, preferred_element_type=f32)      # (8, h_pad)
        out = jnp.dot(pooled, w2_ref[...], preferred_element_type=f32) + b2_ref[...]
        o_ref[0] = out.astype(o_ref.dtype)

    return kernel


# ---------------------------------------------------------------------------
# Padding / prep helpers (hoisted out of the per-call forward)
# ---------------------------------------------------------------------------
def _round_up(v, m):
    return ((v + m - 1) // m) * m


def _pad2d(x, rows, cols):
    r, c = x.shape
    return jnp.pad(x, ((0, rows - r), (0, cols - c)))


def _choose_xw_first(f_pad, h_pad):
    # MXU FLOPs scale with the *padded* contraction dims; ties -> X@W1 first.
    return h_pad <= f_pad


def gcn_norm_adj(edge_index, num_nodes):
    """A_hat = D^-1/2 (A + I) D^-1/2 with A[dst, src] = 1 for each edge."""
    src, dst = edge_index[0], edge_index[1]
    loops = jnp.arange(num_nodes, dtype=edge_index.dtype)
    src = jnp.concatenate([src, loops])
    dst = jnp.concatenate([dst, loops])
    a = jnp.zeros((num_nodes, num_nodes), jnp.float32).at[dst, src].add(1.0)
    deg = a.sum(axis=1)
    d_inv_sqrt = jnp.where(deg > 0.0, 1.0 / jnp.sqrt(deg), 0.0)
    return d_inv_sqrt[:, None] * a * d_inv_sqrt[None, :]


def prepare_adjacency(edge_index, num_nodes):
    """One-time per graph structure: padded bf16 A_hat and f32 pooled row.

    Returns:
      a_p : (n_pad, n_pad) bf16 — padded normalized adjacency
      ap_p: (8, n_pad)     f32  — mean over rows of A_hat in row 0, rows 1-7 zero
    For static graphs, call once and cache the result.
    """
    a_hat = gcn_norm_adj(edge_index, num_nodes)
    a_pooled = jnp.mean(a_hat, axis=0, keepdims=True)     # unsegmented mean only
    n_pad = _round_up(num_nodes, 128)                     # >= bf16 (16,128) tile both axes
    a_p = _pad2d(a_hat, n_pad, n_pad).astype(jnp.bfloat16)
    ap_p = _pad2d(a_pooled, 8, n_pad)                     # keep f32, pad M to 8
    return a_p, ap_p


def prepare_params(params):
    """One-time per parameter set: pad/cast weights for the kernel."""
    f_in, h_dim = params["w1"].shape
    o_dim = params["w2"].shape[1]
    f_pad = _round_up(f_in, 128)
    h_pad = _round_up(h_dim, 128)
    o_pad = _round_up(o_dim, 128)
    return {
        "w1": _pad2d(params["w1"], f_pad, h_pad).astype(jnp.bfloat16),
        "b1": _pad2d(params["b1"].reshape(1, -1), 1, h_pad),   # f32
        "w2": _pad2d(params["w2"], h_pad, o_pad),               # f32 (tiny)
        "b2": _pad2d(params["b2"].reshape(1, -1), 1, o_pad),    # f32
    }


def init_params(key, input_dim, hidden_dim, output_dim):
    k1, k2 = jax.random.split(key)

    def glorot(k, fan_in, fan_out):
        limit = jnp.sqrt(6.0 / (fan_in + fan_out))
        return jax.random.uniform(
            k, (fan_in, fan_out), jnp.float32, minval=-limit, maxval=limit
        )

    return {
        "w1": glorot(k1, input_dim, hidden_dim),
        "b1": jnp.zeros((hidden_dim,), jnp.float32),
        "w2": glorot(k2, hidden_dim, output_dim),
        "b2": jnp.zeros((output_dim,), jnp.float32),
    }


# ---------------------------------------------------------------------------
# Forward: one pallas_call, grid over graphs
# ---------------------------------------------------------------------------
@functools.partial(jax.jit, static_argnames=("out_dim",))
def graph_feature_extractor(prepped, a_p, ap_p, x, *, out_dim):
    """Batched equivalent of GraphFeatureExtractor.forward(x, edge_index, batch=None).

    a_p : (G, n_pad, n_pad) bf16  from prepare_adjacency (stacked)
    ap_p: (G, 8, n_pad)     f32   from prepare_adjacency (stacked)
    x   : (G, N, F)         f32   raw node features
    Returns (G, out_dim) f32 — one pooled graph embedding per graph.
    """
    g, n, f_in = x.shape
    n_pad = a_p.shape[-1]
    f_pad, h_pad = prepped["w1"].shape
    o_pad = prepped["w2"].shape[1]

    # Only per-call prep left in the hot path: pad + cast X.
    x_p = jnp.pad(x, ((0, 0), (0, n_pad - n), (0, f_pad - f_in))).astype(jnp.bfloat16)
    xw_first = _choose_xw_first(f_pad, h_pad)

    flops = g * (
        2 * n_pad * f_pad * h_pad
        + 2 * n_pad * n_pad * (h_pad if xw_first else f_pad)
        + 2 * 8 * n_pad * h_pad
        + 2 * 8 * h_pad * o_pad
    )
    bytes_accessed = (
        g * (2 * n_pad * n_pad + 4 * 8 * n_pad + 2 * n_pad * f_pad + 4 * 8 * o_pad)
        + 2 * f_pad * h_pad + 4 * h_pad + 4 * h_pad * o_pad + 4 * o_pad
    )

    out = pl.pallas_call(
        _make_fused_gcn_kernel(xw_first),
        out_shape=jax.ShapeDtypeStruct((g, 8, o_pad), jnp.float32),
        grid=(g,),
        in_specs=[
            pl.BlockSpec((1, n_pad, n_pad), lambda i: (i, 0, 0)),   # A_hat  (per graph)
            pl.BlockSpec((1, 8, n_pad), lambda i: (i, 0, 0)),       # a_pooled (per graph)
            pl.BlockSpec((1, n_pad, f_pad), lambda i: (i, 0, 0)),   # X      (per graph)
            pl.BlockSpec((f_pad, h_pad), lambda i: (0, 0)),         # W1 (loaded once)
            pl.BlockSpec((1, h_pad), lambda i: (0, 0)),             # b1
            pl.BlockSpec((h_pad, o_pad), lambda i: (0, 0)),         # W2
            pl.BlockSpec((1, o_pad), lambda i: (0, 0)),             # b2
        ],
        out_specs=pl.BlockSpec((1, 8, o_pad), lambda i: (i, 0, 0)),
        compiler_params=pltpu.CompilerParams(
            # Graph axis is embarrassingly parallel -> megacore/2-TC sharding on v7x.
            dimension_semantics=("parallel",),
            vmem_limit_bytes=32 * 1024 * 1024,
        ),
        cost_estimate=pl.CostEstimate(
            flops=flops, transcendentals=0, bytes_accessed=bytes_accessed
        ),
    )(a_p, ap_p, x_p, prepped["w1"], prepped["b1"], prepped["w2"], prepped["b2"])

    # Row 0 of the 8-row pooled block is the real pooled embedding.
    return out[:, 0, :out_dim]


# ---------------------------------------------------------------------------
# References for correctness checking
# ---------------------------------------------------------------------------
def _reference_quant(params, x, a_hat, xw_first=True):
    """Pure-JAX reference with exactly the kernel's mixed precision."""
    bf16, f32 = jnp.bfloat16, jnp.float32
    a = a_hat.astype(bf16)
    xq = x.astype(bf16)
    w1 = params["w1"].astype(bf16)
    if xw_first:
        xw = jnp.dot(xq, w1, preferred_element_type=f32).astype(bf16)
        h = jnp.dot(a, xw, preferred_element_type=f32)
    else:
        ax = jnp.dot(a, xq, preferred_element_type=f32).astype(bf16)
        h = jnp.dot(ax, w1, preferred_element_type=f32)
    h = jnp.maximum(h + params["b1"], 0.0)
    a_pooled = jnp.mean(a_hat, axis=0, keepdims=True)
    pooled = jnp.dot(a_pooled, h, preferred_element_type=f32)
    return jnp.dot(pooled, params["w2"], preferred_element_type=f32) + params["b2"]


def _reference_f32(params, x, a_hat):
    """Exact f32 reference of the original module math (layer2 not hoisted)."""
    h = jnp.maximum(a_hat @ (x @ params["w1"]) + params["b1"], 0.0)
    return jnp.mean(a_hat @ (h @ params["w2"]) + params["b2"],
                    axis=0, keepdims=True)


if __name__ == "__main__":
    N_NODES = 16
    INPUT_DIM = 64
    HIDDEN_DIM = 32
    OUTPUT_DIM = 16
    N_GRAPHS = 2

    key = jax.random.PRNGKey(0)
    k_x, k_p = jax.random.split(key)

    params = init_params(k_p, INPUT_DIM, HIDDEN_DIM, OUTPUT_DIM)

    # Graph 0: undirected ring.  Graph 1: undirected star centered at node 0.
    idx = jnp.arange(N_NODES, dtype=jnp.int32)
    nxt = (idx + 1) % N_NODES
    ring = jnp.stack(
        [jnp.concatenate([idx, nxt]), jnp.concatenate([nxt, idx])], axis=0)
    spokes = jnp.arange(1, N_NODES, dtype=jnp.int32)
    hub = jnp.zeros_like(spokes)
    star = jnp.stack(
        [jnp.concatenate([hub, spokes]), jnp.concatenate([spokes, hub])], axis=0)

    # One-time prep (hoisted out of the hot path; cache for static graphs).
    prepped = prepare_params(params)
    a0, ap0 = prepare_adjacency(ring, N_NODES)
    a1, ap1 = prepare_adjacency(star, N_NODES)
    a_p = jnp.stack([a0, a1])      # (2, 128, 128) bf16
    ap_p = jnp.stack([ap0, ap1])   # (2, 8, 128)  f32

    x = jax.random.normal(k_x, (N_GRAPHS, N_NODES, INPUT_DIM), jnp.float32)

    out = jax.block_until_ready(
        graph_feature_extractor(prepped, a_p, ap_p, x, out_dim=OUTPUT_DIM))
    assert out.shape == (N_GRAPHS, OUTPUT_DIM)

    xw_first = _choose_xw_first(*prepped["w1"].shape)
    for g, ei in enumerate((ring, star)):
        a_hat = gcn_norm_adj(ei, N_NODES)
        # Tight-ish check vs. a reference using identical bf16 quantization
        # (residual diff is f32 accumulation order / matmul precision only).
        ref_q = _reference_quant(params, x[g], a_hat, xw_first=xw_first)
        assert jnp.allclose(out[g], ref_q[0], atol=1e-2, rtol=1e-2), f"quant ref, graph {g}"
        # Loose sanity check vs. exact f32 module math (also validates the
        # mean-pool hoist); difference is bf16 operand quantization.
        ref_f = _reference_f32(params, x[g], a_hat)
        assert jnp.allclose(out[g], ref_f[0], atol=5e-2, rtol=5e-2), f"f32 ref, graph {g}"

    print("KERNEL_OK")
</pallas_src>

<mosaic_0001>
module attributes {stable_mosaic.version = 11 : i64} {
  func.func @kernel(%arg0: i32, %arg1: memref<1x128x128xbf16, #tpu.memory_space<vmem>>, %arg2: memref<1x8x128xf32, #tpu.memory_space<vmem>>, %arg3: memref<1x128x128xbf16, #tpu.memory_space<vmem>>, %arg4: memref<128x128xbf16, #tpu.memory_space<vmem>>, %arg5: memref<1x128xf32, #tpu.memory_space<vmem>>, %arg6: memref<128x128xf32, #tpu.memory_space<vmem>>, %arg7: memref<1x128xf32, #tpu.memory_space<vmem>>, %arg8: memref<1x8x128xf32, #tpu.memory_space<vmem>>) attributes {dimension_semantics = [#tpu.dimension_semantics<parallel>], iteration_bounds = array<i64: 2>, scalar_prefetch = 0 : i64, scratch_operands = 0 : i64, tpu.core_type = #tpu.core_type<tc>, window_params = [{transform_indices = @transform_0, window_bounds = array<i64: 1, 128, 128>}, {transform_indices = @transform_1, window_bounds = array<i64: 1, 8, 128>}, {transform_indices = @transform_2, window_bounds = array<i64: 1, 128, 128>}, {pipeline_mode = #tpu.pipeline_mode<synchronous>, transform_indices = @transform_3, window_bounds = array<i64: 128, 128>}, {pipeline_mode = #tpu.pipeline_mode<synchronous>, transform_indices = @transform_4, window_bounds = array<i64: 1, 128>}, {pipeline_mode = #tpu.pipeline_mode<synchronous>, transform_indices = @transform_5, window_bounds = array<i64: 128, 128>}, {pipeline_mode = #tpu.pipeline_mode<synchronous>, transform_indices = @transform_6, window_bounds = array<i64: 1, 128>}, {transform_indices = @transform_7, window_bounds = array<i64: 1, 8, 128>}]} {
    %c0 = arith.constant 0 : index
    %c0_0 = arith.constant 0 : index
    %c0_1 = arith.constant 0 : index
    %0 = vector.load %arg1[%c0, %c0_0, %c0_1] : memref<1x128x128xbf16, #tpu.memory_space<vmem>>, vector<1x128x128xbf16>
    %1 = vector.shape_cast %0 : vector<1x128x128xbf16> to vector<128x128xbf16>
    %c0_2 = arith.constant 0 : index
    %c0_3 = arith.constant 0 : index
    %c0_4 = arith.constant 0 : index
    %2 = vector.load %arg3[%c0_2, %c0_3, %c0_4] : memref<1x128x128xbf16, #tpu.memory_space<vmem>>, vector<1x128x128xbf16>
    %3 = vector.shape_cast %2 : vector<1x128x128xbf16> to vector<128x128xbf16>
    %c0_5 = arith.constant 0 : index
    %c0_6 = arith.constant 0 : index
    %4 = vector.load %arg4[%c0_5, %c0_6] : memref<128x128xbf16, #tpu.memory_space<vmem>>, vector<128x128xbf16>
    %cst = arith.constant dense<0.000000e+00> : vector<128x128xf32>
    %5 = tpu.matmul %3, %4, %cst {dimension_numbers = #tpu.dot_dimension_numbers<[1], [0], [0], [1], [0, 0, 1, 1], [], []>} : vector<128x128xbf16>, vector<128x128xbf16>, vector<128x128xf32> -> vector<128x128xf32>
    %6 = arith.truncf %5 : vector<128x128xf32> to vector<128x128xbf16>
    %cst_7 = arith.constant dense<0.000000e+00> : vector<128x128xf32>
    %7 = tpu.matmul %1, %6, %cst_7 {dimension_numbers = #tpu.dot_dimension_numbers<[1], [0], [0], [1], [0, 0, 1, 1], [], []>} : vector<128x128xbf16>, vector<128x128xbf16>, vector<128x128xf32> -> vector<128x128xf32>
    %c0_8 = arith.constant 0 : index
    %c0_9 = arith.constant 0 : index
    %8 = vector.load %arg5[%c0_8, %c0_9] : memref<1x128xf32, #tpu.memory_space<vmem>>, vector<1x128xf32>
    %9 = vector.broadcast %8 : vector<1x128xf32> to vector<128x128xf32>
    %10 = arith.addf %7, %9 : vector<128x128xf32>
    %cst_10 = arith.constant 0.000000e+00 : f32
    %11 = vector.broadcast %cst_10 : f32 to vector<128x128xf32>
    %12 = arith.maximumf %10, %11 : vector<128x128xf32>
    %c0_11 = arith.constant 0 : index
    %c0_12 = arith.constant 0 : index
    %c0_13 = arith.constant 0 : index
    %13 = vector.load %arg2[%c0_11, %c0_12, %c0_13] : memref<1x8x128xf32, #tpu.memory_space<vmem>>, vector<1x8x128xf32>
    %14 = vector.shape_cast %13 : vector<1x8x128xf32> to vector<8x128xf32>
    %cst_14 = arith.constant dense<0.000000e+00> : vector<8x128xf32>
    %15 = tpu.matmul %14, %12, %cst_14 {dimension_numbers = #tpu.dot_dimension_numbers<[1], [0], [0], [1], [0, 0, 1, 1], [], []>} : vector<8x128xf32>, vector<128x128xf32>, vector<8x128xf32> -> vector<8x128xf32>
    %c0_15 = arith.constant 0 : index
    %c0_16 = arith.constant 0 : index
    %16 = vector.load %arg6[%c0_15, %c0_16] : memref<128x128xf32, #tpu.memory_space<vmem>>, vector<128x128xf32>
    %cst_17 = arith.constant dense<0.000000e+00> : vector<8x128xf32>
    %17 = tpu.matmul %15, %16, %cst_17 {dimension_numbers = #tpu.dot_dimension_numbers<[1], [0], [0], [1], [0, 0, 1, 1], [], []>} : vector<8x128xf32>, vector<128x128xf32>, vector<8x128xf32> -> vector<8x128xf32>
    %c0_18 = arith.constant 0 : index
    %c0_19 = arith.constant 0 : index
    %18 = vector.load %arg7[%c0_18, %c0_19] : memref<1x128xf32, #tpu.memory_space<vmem>>, vector<1x128xf32>
    %19 = vector.broadcast %18 : vector<1x128xf32> to vector<8x128xf32>
    %20 = arith.addf %17, %19 : vector<8x128xf32>
    %c0_20 = arith.constant 0 : index
    %c0_21 = arith.constant 0 : index
    %c0_22 = arith.constant 0 : index
    %21 = vector.load %arg8[%c0_20, %c0_21, %c0_22] : memref<1x8x128xf32, #tpu.memory_space<vmem>>, vector<1x8x128xf32>
    %22 = vector.shape_cast %21 : vector<1x8x128xf32> to vector<8x128xf32>
    %23 = vector.shape_cast %20 : vector<8x128xf32> to vector<1x8x128xf32>
    tpu.vector_store %arg8[%c0_20, %c0_21, %c0_22], %23 {strides = array<i32>} : memref<1x8x128xf32, #tpu.memory_space<vmem>>, vector<1x8x128xf32>,
    return
  }
  func.func @transform_0(%arg0: i32) -> (i32, i32, i32) {
    %c0_i32 = arith.constant 0 : i32
    %c0_i32_0 = arith.constant 0 : i32
    %c0_i32_1 = arith.constant 0 : i32
    return %arg0, %c0_i32, %c0_i32_0 : i32, i32, i32
  }
  func.func @transform_1(%arg0: i32) -> (i32, i32, i32) {
    %c0_i32 = arith.constant 0 : i32
    %c0_i32_0 = arith.constant 0 : i32
    %c0_i32_1 = arith.constant 0 : i32
    return %arg0, %c0_i32, %c0_i32_0 : i32, i32, i32
  }
  func.func @transform_2(%arg0: i32) -> (i32, i32, i32) {
    %c0_i32 = arith.constant 0 : i32
    %c0_i32_0 = arith.constant 0 : i32
    %c0_i32_1 = arith.constant 0 : i32
    return %arg0, %c0_i32, %c0_i32_0 : i32, i32, i32
  }
  func.func @transform_3(%arg0: i32) -> (i32, i32) {
    %c0_i32 = arith.constant 0 : i32
    %c0_i32_0 = arith.constant 0 : i32
    %c0_i32_1 = arith.constant 0 : i32
    return %c0_i32, %c0_i32_0 : i32, i32
  }
  func.func @transform_4(%arg0: i32) -> (i32, i32) {
    %c0_i32 = arith.constant 0 : i32
    %c0_i32_0 = arith.constant 0 : i32
    %c0_i32_1 = arith.constant 0 : i32
    return %c0_i32, %c0_i32_0 : i32, i32
  }
  func.func @transform_5(%arg0: i32) -> (i32, i32) {
    %c0_i32 = arith.constant 0 : i32
    %c0_i32_0 = arith.constant 0 : i32
    %c0_i32_1 = arith.constant 0 : i32
    return %c0_i32, %c0_i32_0 : i32, i32
  }
  func.func @transform_6(%arg0: i32) -> (i32, i32) {
    %c0_i32 = arith.constant 0 : i32
    %c0_i32_0 = arith.constant 0 : i32
    %c0_i32_1 = arith.constant 0 : i32
    return %c0_i32, %c0_i32_0 : i32, i32
  }
  func.func @transform_7(%arg0: i32) -> (i32, i32, i32) {
    %c0_i32 = arith.constant 0 : i32
    %c0_i32_0 = arith.constant 0 : i32
    %c0_i32_1 = arith.constant 0 : i32
    return %arg0, %c0_i32, %c0_i32_0 : i32, i32, i32
  }
}

</mosaic_0001>

<bundles_post_ra>
// kernel: graph_feature_extractor.1
= control target key start
LH: loop header
LB: loop body
LE: loop exit
PB: predicated region body
PF: predicated region fallthrough
CT: control target
= control target key end

     0   :  { %12 = vsyncpa [#allocation3], 0  ;;  %s1757_s0 = inlined_call_operand.vmem [shape: bf16[2,128,128], index: 0, kind: input, shape index: {}]   ;;  %s1758_s1 = inlined_call_operand.vmem [shape: f32[2,8,128], index: 1, kind: input, shape index: {}]   ;;  %s1759_s2 = inlined_call_operand.vmem [shape: bf16[2,128,128], index: 2, kind: input, shape index: {}]   ;;  %s1760_s3 = inlined_call_operand.vmem [shape: bf16[128,128], index: 3, kind: input, shape index: {}]   ;;  %s1761_s4 = inlined_call_operand.hbm [shape: f32[1,128], index: 4, kind: input, shape index: {}]   ;;  %s1762_s5 = inlined_call_operand.hbm [shape: f32[128,128], index: 5, kind: input, shape index: {}]   ;;  %s1763_s6 = inlined_call_operand.hbm [shape: f32[1,128], index: 6, kind: input, shape index: {}]   ;;  %s1764_s7 = inlined_call_operand.vmem [shape: f32[2,8,128], index: 7, kind: output, shape index: {}]  }
   0x1   :  { %13 = vsyncpa [#allocation5], 0  ;;  %s1556_s24 = smov 0  }
   0x2 LB: > { %s1508_s25 = smov [#allocation4]   ;;  %s1562_s27 = sadd.s32 4294967295, %s1506_s24   ;;  %s1506_s24 = sphi %s1556_s24, %s19_s24  }
   0x3   : > { %s238_s26 = sshll.u32 %s1508_s25, 4  ;;  %p1047_p0 = scmp.ge.s32.totalorder %s1506_s24, 1  ;;  %s1571_s26 = int_to_ptr.vmem [resolvable:$true] %s238_s26 }
   0x4   : > { %p212_p1 = scmp.lt.s32.totalorder %s1506_s24, 3  ;;  %p1362_p2 = scmp.eq.s32.totalorder %s1562_s27, 0 }
   0x5   : > { %s1509_s29 = smov [#allocation2]   ;;  %s1510_s9 = smov [#allocation6]  }
   0x6   : > { %p1567_p3 = pnand %p1047_p0, %p212_p1  ;;  %s228_s30 = sshll.u32 %s1509_s29, 4  ;;  %s1581_s30 = int_to_ptr.vmem [resolvable:$true] %s228_s30 }
   0x7   : > { %s252_s10 = sshll.u32 %s1510_s9, 4  ;;  %s1408_s13 = scalar_lea.hbm %s1762_s5, 2048  ;;  %s1583_s10 = int_to_ptr.vmem [resolvable:$true] %s252_s10 }
   0x8   : > { %p1352_p4 = pneg %p1567_p3  ;;  %p1409_p6 = scmp.ne.s32.totalorder %s1762_s5, %s1408_s13 }
   0x9   : > { %p1415_p10 = scmp.lt.u32.totalorder %s1408_s13, %s1762_s5 }
   0xa   : > { %p1577_p5 = pnand %p1362_p2, %p1352_p4 }
   0xc   : > { %p1593_p7 = pneg %p1577_p5 }
   0xe   : > { %p1411_p8 = pnand %p1593_p7, %p1409_p6 }
  0x10   : > { %p1412_p9 = pneg %p1411_p8 }
  0x12   : > { %p1417_p11 = pnand %p1415_p10, %p1412_p9 }
  0x14   : > { %1420 = shalt.err (!%p1417_p11)
}
  0x15   : > { %s1421_s19 = scalar_lea.vmem %s1571_s26, 2048  ;;  %p1429_p1 = scmp.lt.s32.totalorder %s1571_s26, %s1571_s26 }
  0x16   : > { %p1422_p12 = scmp.ne.s32.totalorder %s1571_s26, %s1421_s19  ;;  %p1430_p4 = scmp.lt.s32.totalorder %s1421_s19, %s1421_s19 }
  0x18   : > { %p1424_p13 = pnand %p1422_p12, %p1593_p7  ;;  %p1431_p6 = por %p1430_p4, %p1429_p1 }
  0x1a   : > { %p1425_p0 = pneg %p1424_p13 }
  0x1c   : > { %p1432_p8 = pnand %p1431_p6, %p1425_p0 }
  0x1e   : > { %1435 = shalt.err (!%p1432_p8)
}
  0x1f   : > { %s1511_s20 = smov 128   ;;  %s1512_s21 = smov 8  }
  0x20   : > { %1358 = dma.hbm_to_vmem [thread:$0]  (!%p1577_p5), %s1762_s5, 2048, %s1571_s26, [#allocation5], %s1511_s20, %s1511_s20, %s1512_s21  }
  0x21   : > { %s1436_s9 = scalar_lea.hbm %s1761_s4, 16 }
  0x22   : > { %p1437_p9 = scmp.ne.s32.totalorder %s1761_s4, %s1436_s9  ;;  %p1443_p12 = scmp.lt.u32.totalorder %s1436_s9, %s1761_s4 }
  0x24   : > { %p1439_p10 = pnand %p1437_p9, %p1593_p7 }
  0x26   : > { %p1440_p11 = pneg %p1439_p10 }
  0x28   : > { %p1445_p13 = pnand %p1443_p12, %p1440_p11 }
  0x2a   : > { %1448 = shalt.err (!%p1445_p13)
}
  0x2b   : > { %s1449_s26 = scalar_lea.vmem %s1581_s30, 16  ;;  %s1456_s15 = scalar_lea.vmem %s1581_s30, 32 }
  0x2c   : > { %p1450_p0 = scmp.ne.s32.totalorder %s1581_s30, %s1449_s26  ;;  %p1457_p6 = scmp.lt.s32.totalorder %s1581_s30, %s1581_s30 }
  0x2d   : > { %p1458_p8 = scmp.lt.s32.totalorder %s1456_s15, %s1449_s26 }
  0x2e   : > { %p1452_p1 = pnand %p1450_p0, %p1593_p7 }
  0x2f   : > { %p1459_p9 = por %p1458_p8, %p1457_p6 }
  0x30   : > { %p1453_p4 = pneg %p1452_p1 }
  0x32   : > { %p1460_p10 = pnand %p1459_p9, %p1453_p4 }
  0x34   : > { %1463 = shalt.err (!%p1460_p10)
}
  0x35   : > { %1355 = dma.hbm_to_vmem [thread:$0]  (!%p1577_p5), %s1761_s4, 16, %s1581_s30, [#allocation3]  }
  0x36   : > { %s1464_s21 = scalar_lea.hbm %s1763_s6, 16 }
  0x37   : > { %p1465_p11 = scmp.ne.s32.totalorder %s1763_s6, %s1464_s21  ;;  %p1471_p0 = scmp.lt.u32.totalorder %s1464_s21, %s1763_s6 }
  0x39   : > { %p1467_p12 = pnand %p1465_p11, %p1593_p7 }
  0x3b   : > { %p1468_p13 = pneg %p1467_p12 }
  0x3d   : > { %p1473_p1 = pnand %p1471_p0, %p1468_p13 }
  0x3f   : > { %1476 = shalt.err (!%p1473_p1)
}
  0x40   : > { %s1477_s30 = scalar_lea.vmem %s1583_s10, 16  ;;  %s1484_s9 = scalar_lea.vmem %s1583_s10, 32 }
  0x41   : > { %p1478_p4 = scmp.ne.s32.totalorder %s1583_s10, %s1477_s30  ;;  %p1485_p9 = scmp.lt.s32.totalorder %s1583_s10, %s1583_s10 }
  0x42   : > { %p1486_p10 = scmp.lt.s32.totalorder %s1484_s9, %s1477_s30 }
  0x43   : > { %p1480_p6 = pnand %p1478_p4, %p1593_p7 }
  0x44   : > { %p1487_p11 = por %p1486_p10, %p1485_p9 }
  0x45   : > { %p1481_p8 = pneg %p1480_p6 }
  0x47   : > { %p1488_p12 = pnand %p1487_p11, %p1481_p8 }
  0x49   : > { %1491 = shalt.err (!%p1488_p12)
}
  0x4a   : > { %1361 = dma.hbm_to_vmem [thread:$0]  (!%p1577_p5), %s1763_s6, 16, %s1583_s10, [#allocation5]  }
  0x4b   : > { %288 = sbr.rel (%p1567_p3) target bundleno = 1046 (0x416), region = 48 }
  0x52   : > { %1497 = dma.done.wait (%p1362_p2), [#allocation3], 16  }
  0x53   : > { %1499 = vsyncadd (%p1362_p2), [#allocation3], 4294967280 }
  0x54   : > { %1501 = dma.done.wait (%p1362_p2), [#allocation5], 2064  }
  0x55   : > { %1503 = vsyncadd (%p1362_p2), [#allocation5], 4294965232  ;;  %p336_p7 = scmp.lt.s32.totalorder %s1562_s27, 1  ;;  %v1384_v0 = vld [vmem:[%s1760_s3] sm:$0xff]   ;;  %v1385_v1 = vld [vmem:[%s1760_s3 + $0x8] sm:$0xff]   ;;  %v1513_v48 = vmov 0.0|0.0  }
  0x56   : > { %1158 = vmatprep.subr.bf16.mxu0 %v1384_v0  ;;  %v1386_v2 = vld [vmem:[%s1760_s3 + $0x10] sm:$0xff]   ;;  %v1387_v3 = vld [vmem:[%s1760_s3 + $0x18] sm:$0xff]   ;;  %v1388_v5 = vld [vmem:[%s1760_s3 + $0x20] sm:$0xff]   ;;  %vm1514_vm0 = vmmov 0   ;;  %v1515_v49 = vmov 0.0  }
  0x57   : > { %s1769_s27 = smov (!%p336_p7, %s1562_s27), 1  ;;  %1159 = vmatpush3.bf16.msra.mxu0 %v1384_v0  ;;  %v1389_v6 = vld [vmem:[%s1760_s3 + $0x28] sm:$0xff]   ;;  %v1390_v7 = vld [vmem:[%s1760_s3 + $0x30] sm:$0xff]   ;;  %v1391_v8 = vld [vmem:[%s1760_s3 + $0x38] sm:$0xff]  }
  0x58   : > { %s1090_s13 = sshll.u32 %s1769_s27, 6  ;;  %1160 = vmatprep.subr.bf16.mxu0 %v1385_v1  ;;  %v843_v50 = vld [vmem:[#allocation4] sm:$0xff]  ;;  %v844_v51 = vld [vmem:[#allocation4 + $0x8] sm:$0xff]  ;;  %v845_v52 = vld [vmem:[#allocation4 + $0x10] sm:$0xff]  ;;  %s1058_s10 = sshll.u32 %s1769_s27, 3 }
  0x59   : > { %s1691_s18 = scalar_lea.vmem %s1759_s2, %s1090_s13  ;;  %s1721_s28 = scalar_lea.vmem %s1757_s0, %s1090_s13  ;;  %v1317_v53 = vpack.c.bf16 %v844_v51, %v843_v50  ;;  %v846_v54 = vld [vmem:[#allocation4 + $0x18] sm:$0xff]  ;;  %v847_v56 = vld [vmem:[#allocation4 + $0x20] sm:$0xff]  ;;  %v848_v57 = vld [vmem:[#allocation4 + $0x28] sm:$0xff] }
  0x5a   : > { %v1392_v4 = vld [vmem:[%s1691_s18] sm:$0xff]   ;;  %v1393_v9 = vld [vmem:[%s1691_s18 + $0x8] sm:$0xff]   ;;  %v1394_v10 = vld [vmem:[%s1691_s18 + $0x10] sm:$0xff]   ;;  %v1320_v55 = vpack.c.bf16 %v846_v54, %v845_v52  ;;  %v1323_v58 = vpack.c.bf16 %v848_v57, %v847_v56  ;;  %s344_s14 = scalar_lea.vmem %s1758_s1, %s1058_s10  ;;  %s353_s17 = scalar_lea.vmem %s1764_s7, %s1058_s10 }
  0x5b   : > { %1161 = vmatpush3.bf16.msra.mxu0 %v1385_v1  ;;  %1174 = vmatprep.mubr.bf16.mxu0 %v1392_v4  ;;  %v1395_v11 = vld [vmem:[%s1691_s18 + $0x18] sm:$0xff]   ;;  %v1396_v12 = vld [vmem:[%s1691_s18 + $0x20] sm:$0xff]   ;;  %v1397_v13 = vld [vmem:[%s1691_s18 + $0x28] sm:$0xff]  }
  0x5c   : > { %1162 = vmatprep.subr.bf16.mxu0 %v1386_v2  ;;  %v1398_v14 = vld [vmem:[%s1691_s18 + $0x30] sm:$0xff]   ;;  %v1399_v15 = vld [vmem:[%s1691_s18 + $0x38] sm:$0xff]   ;;  %v1400_v16 = vld [vmem:[%s1721_s28] sm:$0xff]  }
  0x5d   : > { %1206 = vmatprep.mubr.bf16.mxu1 %v1400_v16  ;;  %v1401_v41 = vld [vmem:[%s1721_s28 + $0x8] sm:$0xff]   ;;  %v1402_v42 = vld [vmem:[%s1721_s28 + $0x10] sm:$0xff]   ;;  %v1403_v43 = vld [vmem:[%s1721_s28 + $0x18] sm:$0xff]  }
  0x5e   : > { %v1404_v44 = vld [vmem:[%s1721_s28 + $0x20] sm:$0xff]   ;;  %v1405_v45 = vld [vmem:[%s1721_s28 + $0x28] sm:$0xff]   ;;  %v1406_v46 = vld [vmem:[%s1721_s28 + $0x30] sm:$0xff]  }
  0x5f   : > { %1163 = vmatpush3.bf16.msra.mxu0 %v1386_v2  ;;  %v1407_v47 = vld [vmem:[%s1721_s28 + $0x38] sm:$0xff]   ;;  %v851_v62 = vld [vmem:[#allocation4 + $0x40] sm:$0xff]  ;;  %v852_v63 = vld [vmem:[#allocation4 + $0x48] sm:$0xff] }
  0x60   : > { %1164 = vmatprep.subr.bf16.mxu0 %v1387_v3  ;;  %v849_v59 = vld [vmem:[#allocation4 + $0x30] sm:$0xff]  ;;  %v850_v60 = vld [vmem:[#allocation4 + $0x38] sm:$0xff]  ;;  %v1329_v0 = vpack.c.bf16 %v852_v63, %v851_v62  ;;  %v855_v4 = vld [vmem:[#allocation4 + $0x60] sm:$0xff] }
  0x61   : > { %v1326_v61 = vpack.c.bf16 %v850_v60, %v849_v59  ;;  %v853_v1 = vld [vmem:[#allocation4 + $0x50] sm:$0xff]  ;;  %v854_v2 = vld [vmem:[#allocation4 + $0x58] sm:$0xff] }
  0x63   : > { %1165 = vmatpush3.bf16.msra.mxu0 %v1387_v3  ;;  %v1332_v3 = vpack.c.bf16 %v854_v2, %v853_v1 }
  0x64   : > { %1166 = vmatprep.subr.bf16.mxu0 %v1388_v5 }
  0x67   : > { %1167 = vmatpush3.bf16.msra.mxu0 %v1388_v5  ;;  %v856_v5 = vld [vmem:[#allocation4 + $0x68] sm:$0xff] }
  0x68   : > { %1168 = vmatprep.subr.bf16.mxu0 %v1389_v6 }
  0x6b   : > { %1169 = vmatpush3.bf16.msra.mxu0 %v1389_v6  ;;  %v1335_v6 = vpack.c.bf16 %v856_v5, %v855_v4  ;;  %v772_v4 = vld [vmem:[%s344_s14] sm:$0xff] }
  0x6c   : > { %1170 = vmatprep.subr.bf16.mxu0 %v1390_v7 }
  0x6f   : > { %1171 = vmatpush3.bf16.msra.mxu0 %v1390_v7  ;;  %v857_v7 = vld [vmem:[#allocation4 + $0x70] sm:$0xff] }
  0x70   : > { %1172 = vmatprep.subr.bf16.mxu0 %v1391_v8 }
  0x73   : > { %1173 = vmatpush3.bf16.msra.mxu0 %v1391_v8  ;;  %v858_v8 = vld [vmem:[#allocation4 + $0x78] sm:$0xff] }
  0x74   : > { %1292 = vmatprep.subr.bf16.mxu0 %v1513_v48 }
  0x76   : > { %1175 = vmatmul.mubr.bf16.vlgmr.msra.gmra.mrb[0].mxu0 %v1393_v9  ;;  %v1338_v9 = vpack.c.bf16 %v858_v8, %v857_v7  ;;  %v1087_v7 = vld [vmem:[#allocation6] ss:$0 sm:$0xff] }
  0x77   : > { %1178 = vmatprep.mubr.bf16.mxu0 %v1394_v10  ;;  %v1078_v10 = vld [vmem:[#allocation2] ss:$0 sm:$0xff] }
  0x7e   : > { %1179 = vmatmul.mubr.bf16.gmra.mrb[4].mxu0 %v1395_v11 }
  0x7f   : > { %1182 = vmatprep.mubr.bf16.mxu0 %v1396_v12 }
  0x86   : > { %1183 = vmatmul.mubr.bf16.gmra.mrb[8].mxu0 %v1397_v13 }
  0x87   : > { %1186 = vmatprep.mubr.bf16.mxu0 %v1398_v14 }
  0x8e   : > { %1187 = vmatmul.mubr.bf16.gmra.mrb[12].mxu0 %v1399_v15 }
  0x8f   : > { %1254 = vmatprep.mubr.msk.f32.mxu0 %vm1514_vm0, %v1515_v49 }
 0x149   : > { %v1176_v17 = vpop.f32.mrb[0].mxu0 }
 0x14a   : > { %v533_v18 = vpop.f32.mrb[1].mxu0 }
 0x14b   : > { %v1177_v19 = vpop.f32.mrb[2].mxu0 }
 0x14c   : > { %v597_v20 = vpack.c.bf16 %v1177_v19, %v1176_v17  ;;  %v536_v21 = vpop.f32.mrb[3].mxu0 }
 0x14d   : > { %v596_v22 = vpack.c.bf16 %v536_v21, %v533_v18 }
 0x14f   : > { %1190 = vmatprep.subr.bf16.mxu1 %v596_v22 }
 0x150   : > { %1191 = vmatpush3.bf16.msra.mxu1 %v596_v22 }
 0x151   : > { %v1180_v23 = vpop.f32.mrb[4].mxu0  ;;  %1192 = vmatprep.subr.bf16.mxu1 %v597_v20 }
 0x152   : > { %v549_v24 = vpop.f32.mrb[5].mxu0 }
 0x153   : > { %v1181_v25 = vpop.f32.mrb[6].mxu0 }
 0x154   : > { %v599_v26 = vpack.c.bf16 %v1181_v25, %v1180_v23  ;;  %v552_v27 = vpop.f32.mrb[7].mxu0  ;;  %1193 = vmatpush3.bf16.msra.mxu1 %v597_v20 }
 0x155   : > { %v598_v28 = vpack.c.bf16 %v552_v27, %v549_v24 }
 0x157   : > { %1194 = vmatprep.subr.bf16.mxu1 %v598_v28 }
 0x158   : > { %1195 = vmatpush3.bf16.msra.mxu1 %v598_v28 }
 0x159   : > { %v1184_v29 = vpop.f32.mrb[8].mxu0  ;;  %1196 = vmatprep.subr.bf16.mxu1 %v599_v26 }
 0x15a   : > { %v565_v30 = vpop.f32.mrb[9].mxu0 }
 0x15b   : > { %v1185_v31 = vpop.f32.mrb[10].mxu0 }
 0x15c   : > { %v601_v32 = vpack.c.bf16 %v1185_v31, %v1184_v29  ;;  %v568_v33 = vpop.f32.mrb[11].mxu0  ;;  %1197 = vmatpush3.bf16.msra.mxu1 %v599_v26 }
 0x15d   : > { %v600_v34 = vpack.c.bf16 %v568_v33, %v565_v30 }
 0x15f   : > { %1198 = vmatprep.subr.bf16.mxu1 %v600_v34 }
 0x160   : > { %1199 = vmatpush3.bf16.msra.mxu1 %v600_v34 }
 0x161   : > { %v1188_v35 = vpop.f32.mrb[12].mxu0  ;;  %1200 = vmatprep.subr.bf16.mxu1 %v601_v32 }
 0x162   : > { %v581_v36 = vpop.f32.mrb[13].mxu0 }
 0x163   : > { %v1189_v37 = vpop.f32.mrb[14].mxu0 }
 0x164   : > { %v603_v38 = vpack.c.bf16 %v1189_v37, %v1188_v35  ;;  %v584_v39 = vpop.f32.mrb[15].mxu0  ;;  %1201 = vmatpush3.bf16.msra.mxu1 %v601_v32 }
 0x165   : > { %v602_v40 = vpack.c.bf16 %v584_v39, %v581_v36 }
 0x167   : > { %1202 = vmatprep.subr.bf16.mxu1 %v602_v40 }
 0x168   : > { %1203 = vmatpush3.bf16.msra.mxu1 %v602_v40 }
 0x169   : > { %1204 = vmatprep.subr.bf16.mxu1 %v603_v38 }
 0x16c   : > { %1205 = vmatpush3.bf16.msra.mxu1 %v603_v38 }
 0x16d   : > { %1316 = vmatprep.subr.bf16.mxu1 %v1513_v48 }
 0x16f   : > { %1207 = vmatmul.mubr.bf16.vlgmr.msra.gmra.mrb[0].mxu1 %v1401_v41 }
 0x170   : > { %1210 = vmatprep.mubr.bf16.mxu1 %v1402_v42  ;;  %1318 = vmatpush3.bf16.msra.mxu1 %v1317_v53 }
 0x171   : > { %1319 = vmatprep.subr.bf16.mxu1 %v1513_v48 }
 0x174   : > { %1321 = vmatpush3.bf16.msra.mxu1 %v1320_v55 }
 0x175   : > { %1322 = vmatprep.subr.bf16.mxu1 %v1513_v48 }
 0x177   : > { %1211 = vmatmul.mubr.bf16.gmra.mrb[4].mxu1 %v1403_v43 }
 0x178   : > { %1214 = vmatprep.mubr.bf16.mxu1 %v1404_v44  ;;  %1324 = vmatpush3.bf16.msra.mxu1 %v1323_v58 }
 0x179   : > { %1325 = vmatprep.subr.bf16.mxu1 %v1513_v48 }
 0x17c   : > { %1327 = vmatpush3.bf16.msra.mxu1 %v1326_v61 }
 0x17d   : > { %1328 = vmatprep.subr.bf16.mxu1 %v1513_v48 }
 0x17f   : > { %1215 = vmatmul.mubr.bf16.gmra.mrb[8].mxu1 %v1405_v45 }
 0x180   : > { %1218 = vmatprep.mubr.bf16.mxu1 %v1406_v46  ;;  %1330 = vmatpush3.bf16.msra.mxu1 %v1329_v0 }
 0x181   : > { %1331 = vmatprep.subr.bf16.mxu1 %v1513_v48 }
 0x184   : > { %1333 = vmatpush3.bf16.msra.mxu1 %v1332_v3 }
 0x185   : > { %1334 = vmatprep.subr.bf16.mxu1 %v1513_v48 }
 0x187   : > { %1219 = vmatmul.mubr.bf16.gmra.mrb[12].mxu1 %v1407_v47 }
 0x188   : > { %1289 = vmatprep.mubr.msk.f32.mxu1 %vm1514_vm0, %v1515_v49  ;;  %1336 = vmatpush3.bf16.msra.mxu1 %v1335_v6 }
 0x189   : > { %1337 = vmatprep.subr.bf16.mxu1 %v1513_v48 }
 0x18c   : > { %1339 = vmatpush3.bf16.msra.mxu1 %v1338_v9 }
 0x242   : > { %v1208_v11 = vpop.f32.mrb[0].mxu1 }
 0x243   : > { %v702_v12 = vadd.f32 %v1208_v11, %v1078_v10  ;;  %v693_v13 = vpop.f32.mrb[1].mxu1 }
 0x244   : > { %v694_v14 = vadd.f32 %v1078_v10, %v693_v13  ;;  %v1209_v15 = vpop.f32.mrb[2].mxu1 }
 0x245   : > { %v705_v16 = vadd.f32 %v1209_v15, %v1078_v10  ;;  %v696_v17 = vpop.f32.mrb[3].mxu1  ;;  %v758_v19 = vmax.f32 %v702_v12, 0.0 }
 0x246   : > { %v697_v18 = vadd.f32 %v1078_v10, %v696_v17  ;;  %v756_v21 = vmax.f32 %v694_v14, 0.0 }
 0x247   : > { %v759_v20 = vmax.f32 %v705_v16, 0.0 }
 0x248   : > { %v757_v22 = vmax.f32 %v697_v18, 0.0 }
 0x249   : > { %v1296_v23 = vpack.c.bf16 %v759_v20, %v758_v19 }
 0x24a   : > { %v1293_v24 = vpack.c.bf16 %v757_v22, %v756_v21  ;;  %v1212_v25 = vpop.f32.mrb[4].mxu1 }
 0x24b   : > { %v718_v26 = vadd.f32 %v1212_v25, %v1078_v10  ;;  %v709_v27 = vpop.f32.mrb[5].mxu1 }
 0x24c   : > { %v710_v28 = vadd.f32 %v1078_v10, %v709_v27  ;;  %v1213_v29 = vpop.f32.mrb[6].mxu1  ;;  %1294 = vmatpush3.bf16.msra.mxu0 %v1293_v24 }
 0x24d   : > { %v721_v30 = vadd.f32 %v1213_v29, %v1078_v10  ;;  %v712_v31 = vpop.f32.mrb[7].mxu1  ;;  %1295 = vmatprep.subr.bf16.mxu0 %v1513_v48  ;;  %v762_v33 = vmax.f32 %v718_v26, 0.0 }
 0x24e   : > { %v713_v32 = vadd.f32 %v1078_v10, %v712_v31  ;;  %v760_v35 = vmax.f32 %v710_v28, 0.0 }
 0x24f   : > { %v763_v34 = vmax.f32 %v721_v30, 0.0 }
 0x250   : > { %v761_v36 = vmax.f32 %v713_v32, 0.0  ;;  %1297 = vmatpush3.bf16.msra.mxu0 %v1296_v23 }
 0x251   : > { %v1302_v37 = vpack.c.bf16 %v763_v34, %v762_v33  ;;  %1298 = vmatprep.subr.bf16.mxu0 %v1513_v48 }
 0x252   : > { %v1299_v38 = vpack.c.bf16 %v761_v36, %v760_v35  ;;  %v1216_v39 = vpop.f32.mrb[8].mxu1 }
 0x253   : > { %v734_v40 = vadd.f32 %v1216_v39, %v1078_v10  ;;  %v725_v41 = vpop.f32.mrb[9].mxu1 }
 0x254   : > { %v726_v42 = vadd.f32 %v1078_v10, %v725_v41  ;;  %v1217_v43 = vpop.f32.mrb[10].mxu1  ;;  %1300 = vmatpush3.bf16.msra.mxu0 %v1299_v38 }
 0x255   : > { %v737_v44 = vadd.f32 %v1217_v43, %v1078_v10  ;;  %v728_v45 = vpop.f32.mrb[11].mxu1  ;;  %1301 = vmatprep.subr.bf16.mxu0 %v1513_v48  ;;  %v766_v47 = vmax.f32 %v734_v40, 0.0 }
 0x256   : > { %v729_v46 = vadd.f32 %v1078_v10, %v728_v45  ;;  %v764_v50 = vmax.f32 %v726_v42, 0.0 }
 0x257   : > { %v767_v49 = vmax.f32 %v737_v44, 0.0 }
 0x258   : > { %v765_v51 = vmax.f32 %v729_v46, 0.0  ;;  %1303 = vmatpush3.bf16.msra.mxu0 %v1302_v37 }
 0x259   : > { %v1308_v52 = vpack.c.bf16 %v767_v49, %v766_v47  ;;  %1304 = vmatprep.subr.bf16.mxu0 %v1513_v48 }
 0x25a   : > { %v1305_v53 = vpack.c.bf16 %v765_v51, %v764_v50  ;;  %v1220_v54 = vpop.f32.mrb[12].mxu1 }
 0x25b   : > { %v750_v55 = vadd.f32 %v1220_v54, %v1078_v10  ;;  %v741_v56 = vpop.f32.mrb[13].mxu1 }
 0x25c   : > { %v742_v57 = vadd.f32 %v1078_v10, %v741_v56  ;;  %v1221_v58 = vpop.f32.mrb[14].mxu1  ;;  %1306 = vmatpush3.bf16.msra.mxu0 %v1305_v53 }
 0x25d   : > { %v753_v59 = vadd.f32 %v1221_v58, %v1078_v10  ;;  %v744_v60 = vpop.f32.mrb[15].mxu1  ;;  %1307 = vmatprep.subr.bf16.mxu0 %v1513_v48  ;;  %v770_v62 = vmax.f32 %v750_v55, 0.0 }
 0x25e   : > { %v745_v61 = vadd.f32 %v1078_v10, %v744_v60  ;;  %v768_v0 = vmax.f32 %v742_v57, 0.0 }
 0x25f   : > { %v771_v63 = vmax.f32 %v753_v59, 0.0 }
 0x260   : > { %v769_v1 = vmax.f32 %v745_v61, 0.0  ;;  %1309 = vmatpush3.bf16.msra.mxu0 %v1308_v52 }
 0x261   : > { %v1314_v2 = vpack.c.bf16 %v771_v63, %v770_v62  ;;  %1310 = vmatprep.subr.bf16.mxu0 %v1513_v48 }
 0x262   : > { %v1311_v3 = vpack.c.bf16 %v769_v1, %v768_v0 }
 0x264   : > { %1312 = vmatpush3.bf16.msra.mxu0 %v1311_v3 }
 0x265   : > { %1313 = vmatprep.subr.bf16.mxu0 %v1513_v48 }
 0x268   : > { %1315 = vmatpush3.bf16.msra.mxu0 %v1314_v2 }
 0x26b   : > { %1255 = vmatmul.mubr.f32.vlgmr.msra.gmra.mrb[16].mxu0 %v772_v4 }
 0x33e   : > { %v839_v5 = vpop.f32.mrb[16].mxu0 }
 0x33f   : > { %v1256_v6 = vpop.f32.mrb[17].mxu0  ;;  %1290 = vmatmul.mubr.f32.vlgmr.msra.gmra.mrb[16].mxu1 %v839_v5 }
 0x412   : > { %v932_v8 = vpop.f32.mrb[16].mxu1 }
 0x413   : > { %v933_v9 = vadd.f32 %v1087_v7, %v932_v8  ;;  %v1291_v10 = vpop.f32.mrb[17].mxu1 }
 0x415   : > { %936 = vst [vmem:[%s353_s17] sm:$0xff] %v933_v9 }
 0x416 PF: > { %s19_s24 = sadd.s32 1, %s1506_s24  }
 0x417   : > { %p16_p2 = scmp.ge.s32.totalorder %s19_s24, 4  }
 0x419   :  { %18 = sbr.rel (!%p16_p2) target bundleno = 2 (0x2), region = 97 }
 0x420   :  { %956 = vsyncpa [#allocation3], 1 }
 0x421   :  { %958 = vsyncpa [#allocation3 + $0x1], 1 }
 0x422   :  { %959 = vsyncpa [#allocation5], 1 }

</bundles_post_ra>
